<compile_context>
chip_gen: v7x
topology: tpu7x:2x2x1
jax: 0.10.0
libtpu: 0.0.40
codegen_flags: <defaults>
</compile_context>

<pallas_src>
import jax
import jax.numpy as jnp
import numpy as np
from jax import lax
from jax.experimental import pallas as pl
from jax.experimental.pallas import tpu as pltpu

_K = 8                            # DCT block size (fixed by the module)
_TILE_BYTES = 2 * 1024 * 1024     # target payload per side per grid step
_MAX_TWB = 128                    # max block-columns shuffled per strip statement
_MIN_GRID_STEPS = 4               # keep a few steps for pipelining / 2 TCs (v7x)


def _deblock_kernel(x_ref, o_ref):
    """x_ref: (1, tbh, twb, 64)    -- [bh, bw, r*8 + c]   (block layout)
       o_ref: (1, tbh, 8, twb*8)   -- [bh, r, bw*8 + c]   (raster layout)
    """
    tbh, twb = x_ref.shape[1], x_ref.shape[2]

    def move_strip(i):
        # One 8-pixel-high strip: load the whole (twb, 64) slab, do the single
        # bw<->r relayout on the XLU, then store 8 fully lane-dense raster rows
        # with one unmasked strip store.
        blocks = x_ref[0, i].reshape(twb, _K, _K)        # (bw, r, c)
        strip = pltpu.einshape("mhd->hmd", blocks)       # (r, bw, c)
        o_ref[0, i] = strip.reshape(_K, twb * _K)        # (8, twb*8), lane-dense

    if tbh <= 8:
        for i in range(tbh):                 # static indices, fully unrolled
            move_strip(i)
    else:
        def body(i, carry):
            move_strip(i)
            return carry
        lax.fori_loop(0, tbh, body, 0, unroll=8)


def _pick_tiles(hb: int, wb: int, itemsize: int, tile_bytes: int):
    """Pick (tbh, twb): strip-rows and block-columns per grid step."""
    blk = _K * _K * itemsize                 # bytes of one 8x8 block
    # Width tile: full width when small; otherwise a multiple-of-16 divisor so
    # the output block's lane dim (twb*8) is a multiple of 128 (dense stores).
    if wb <= _MAX_TWB:
        twb = wb
    else:
        cands = [d for d in range(16, _MAX_TWB + 1, 16) if wb % d == 0]
        # Fallback (odd widths with no mult-of-16 divisor): full width, which
        # is always BlockSpec-legal; only hit for unusual image widths.
        twb = max(cands) if cands else wb
    # Strip tile: largest divisor of hb fitting the per-side byte budget.
    max_tbh = max(1, tile_bytes // (twb * blk))
    tbh = max((d for d in range(1, hb + 1) if hb % d == 0 and d <= max_tbh),
              default=1)
    return tbh, twb


def deblock_splitting(x: jax.Array, height: int, width: int,
                      *, max_tile_bytes: int = _TILE_BYTES) -> jax.Array:
    """Pallas equivalent of _DeBlockSplitting.forward(x, height, width)."""
    k = _K
    assert height % k == 0 and width % k == 0
    batch = x.shape[0]
    hb, wb = height // k, width // k
    assert x.size == batch * hb * wb * k * k

    # Free (contiguous) reshape: each 8x8 block flattened onto the lane dim.
    x_blocks = jnp.reshape(x, (batch, hb, wb, k * k))

    itemsize = jnp.dtype(x.dtype).itemsize
    tbh, twb = _pick_tiles(hb, wb, itemsize, max_tile_bytes)

    # Keep a handful of grid steps so the DMA pipeline stays busy and, on v7x,
    # both TensorCores get work even at batch=1.
    def n_steps(t):
        return batch * (hb // t) * (wb // twb)
    while tbh > 1 and n_steps(tbh) < _MIN_GRID_STEPS:
        tbh = max(d for d in range(1, tbh) if hb % d == 0)

    grid = (batch, hb // tbh, wb // twb)

    out4 = pl.pallas_call(
        _deblock_kernel,
        out_shape=jax.ShapeDtypeStruct((batch, hb, k, wb * k), x.dtype),
        grid=grid,
        in_specs=[
            pl.BlockSpec((1, tbh, twb, k * k), lambda b, h, w: (b, h, w, 0)),
        ],
        out_specs=pl.BlockSpec((1, tbh, k, twb * k),
                               lambda b, h, w: (b, h, 0, w)),
        compiler_params=pltpu.CompilerParams(
            dimension_semantics=("parallel", "parallel", "parallel"),
            vmem_limit_bytes=32 * 1024 * 1024,
        ),
        cost_estimate=pl.CostEstimate(
            flops=0, transcendentals=0,
            bytes_accessed=2 * batch * hb * wb * k * k * itemsize),
    )(x_blocks)

    # Free (contiguous) reshape: [B, Hb, 8, W] -> [B, H, W].
    return jnp.reshape(out4, (batch, height, width))


def _reference(x, height, width):
    k = _K
    b = x.shape[0]
    x5 = np.asarray(x).reshape(b, height // k, width // k, k, k)
    return x5.transpose(0, 1, 3, 2, 4).reshape(b, height, width)


if __name__ == "__main__":
    key = jax.random.PRNGKey(0)
    fn = jax.jit(deblock_splitting, static_argnums=(1, 2),
                 static_argnames=("max_tile_bytes",))

    cases = [
        (2, 16, 128, _TILE_BYTES),    # small sanity; out rows are exactly 128 lanes
        (1, 16, 2048, _TILE_BYTES),   # wide: width tiling (twb=128), 1024-lane rows
        (1, 512, 64, _TILE_BYTES),    # tall/narrow: in-kernel fori_loop strip path
        (1, 16, 2048, 32 * 1024),     # tiny per-step budget: exercises tile shrinking
    ]
    for (b, h, w, mtb) in cases:
        key, sub = jax.random.split(key)
        n_blocks = (h // _K) * (w // _K)
        x = jax.random.normal(sub, (b, n_blocks, _K, _K), dtype=jnp.float32)
        out = jax.block_until_ready(fn(x, h, w, max_tile_bytes=mtb))
        assert out.shape == (b, h, w)
        np.testing.assert_array_equal(np.asarray(out), _reference(x, h, w))

    print("KERNEL_OK")
</pallas_src>

<mosaic_0001>
module attributes {stable_mosaic.version = 11 : i64} {
  func.func @_deblock_kernel(%arg0: i32, %arg1: i32, %arg2: i32, %arg3: memref<1x1x16x64xf32, #tpu.memory_space<vmem>>, %arg4: memref<1x1x8x128xf32, #tpu.memory_space<vmem>>) attributes {dimension_semantics = [#tpu.dimension_semantics<parallel>, #tpu.dimension_semantics<parallel>, #tpu.dimension_semantics<parallel>], iteration_bounds = array<i64: 2, 2, 1>, scalar_prefetch = 0 : i64, scratch_operands = 0 : i64, tpu.core_type = #tpu.core_type<tc>, window_params = [{transform_indices = @transform_0, window_bounds = array<i64: 1, 1, 16, 64>}, {transform_indices = @transform_1, window_bounds = array<i64: 1, 1, 8, 128>}]} {
    %c0 = arith.constant 0 : index
    %c0_0 = arith.constant 0 : index
    %c0_1 = arith.constant 0 : index
    %c0_2 = arith.constant 0 : index
    %0 = vector.load %arg3[%c0, %c0_0, %c0_1, %c0_2] : memref<1x1x16x64xf32, #tpu.memory_space<vmem>>, vector<1x1x16x64xf32>
    %1 = vector.shape_cast %0 : vector<1x1x16x64xf32> to vector<16x64xf32>
    %2 = vector.shape_cast %1 : vector<16x64xf32> to vector<16x8x8xf32>
    %3 = tpu.transpose %2, [1, 0, 2] : vector<16x8x8xf32> -> vector<8x16x8xf32>
    %4 = vector.shape_cast %3 : vector<8x16x8xf32> to vector<8x128xf32>
    %c0_3 = arith.constant 0 : index
    %c0_4 = arith.constant 0 : index
    %c0_5 = arith.constant 0 : index
    %c0_6 = arith.constant 0 : index
    %5 = vector.load %arg4[%c0_3, %c0_4, %c0_5, %c0_6] : memref<1x1x8x128xf32, #tpu.memory_space<vmem>>, vector<1x1x8x128xf32>
    %6 = vector.shape_cast %5 : vector<1x1x8x128xf32> to vector<8x128xf32>
    %7 = vector.shape_cast %4 : vector<8x128xf32> to vector<1x1x8x128xf32>
    tpu.vector_store %arg4[%c0_3, %c0_4, %c0_5, %c0_6], %7 {strides = array<i32>} : memref<1x1x8x128xf32, #tpu.memory_space<vmem>>, vector<1x1x8x128xf32>,
    return
  }
  func.func @transform_0(%arg0: i32, %arg1: i32, %arg2: i32) -> (i32, i32, i32, i32) {
    %c0_i32 = arith.constant 0 : i32
    %c0_i32_0 = arith.constant 0 : i32
    return %arg0, %arg1, %arg2, %c0_i32 : i32, i32, i32, i32
  }
  func.func @transform_1(%arg0: i32, %arg1: i32, %arg2: i32) -> (i32, i32, i32, i32) {
    %c0_i32 = arith.constant 0 : i32
    %c0_i32_0 = arith.constant 0 : i32
    return %arg0, %arg1, %c0_i32, %arg2 : i32, i32, i32, i32
  }
}

</mosaic_0001>

<bundles_post_ra>
// kernel: deblock_splitting.1
= control target key start
LH: loop header
LB: loop body
LE: loop exit
PB: predicated region body
PF: predicated region fallthrough
CT: control target
= control target key end

     0   :  { %6 = vsyncpa [#allocation3], 0  ;;  %s1821_s0 = inlined_call_operand.vmem [shape: f32[2,2,16,64], index: 0, kind: input, shape index: {}]   ;;  %s1822_s1 = inlined_call_operand.hbm [shape: f32[2,2,8,128], index: 1, kind: output, shape index: {}]  }
   0x1   :  { %8 = vsyncpa [#allocation3 + $0x1], 0  ;;  %s1484_s6 = smov 0   ;;  %s1486_s7 = smov 0  }
   0x2   :  { %s1488_s8 = smov 0   ;;  %s1490_s9 = smov 0  }
   0x3   :  { %s1492_s10 = smov 0   ;;  %s1494_s11 = smov 0  }
   0x4   :  { %s1496_s12 = smov 0   ;;  %s1498_s13 = smov 0  }
   0x5 LB: > { %s1226_s14 = sadd.s32 4294967295, %s1454_s13   ;;  %s1227_s15 = sadd.s32 4294967294, %s1454_s13   ;;  %s1454_s13 = sphi %s1498_s13, %s14_s13   ;;  %s1450_s12 = sphi %s1496_s12, %s1831_s12   ;;  %s1446_s11 = sphi %s1494_s11, %s1830_s11   ;;  %s1442_s10 = sphi %s1492_s10, %s1829_s10   ;;  %s1438_s9 = sphi %s1490_s9, %s1828_s9   ;;  %s1434_s8 = sphi %s1488_s8, %s1827_s8   ;;  %s1430_s7 = sphi %s1486_s7, %s1826_s7   ;;  %s1426_s6 = sphi %s1484_s6, %s1825_s6  }
   0x6   : > { %s29_s16 = sadd.s32 1, %s1446_s11  ;;  %s33_s17 = sadd.s32 1, %s1450_s12 }
   0x7   : > { %p31_p0 = scmp.ge.s32.totalorder %s29_s16, 2  ;;  %p84_p1 = scmp.ne.s32.totalorder %s1434_s8, %s1430_s7 }
   0x8   : > { %p85_p2 = scmp.eq.s32.totalorder %s1226_s14, 3  ;;  %p90_p5 = scmp.ne.s32.totalorder %s1430_s7, %s1426_s6 }
   0x9   : > { %s1833_s16 = smov (%p31_p0, %s29_s16), 0  ;;  %s1835_s17 = smov (!%p31_p0, %s33_s17), %s1450_s12 }
   0xa   : > { %s68_s18 = ssub.s32 %s1446_s11, %s1833_s16  ;;  %p1535_p3 = por %p85_p2, %p84_p1 }
   0xb   : > { %p35_p4 = scmp.ge.s32.totalorder %s1835_s17, 2  ;;  %p91_p6 = scmp.eq.s32.totalorder %s1227_s15, 3 }
   0xc   : > { %p1230_p7 = scmp.ge.s32.totalorder %s1454_s13, 1  ;;  %p126_p9 = scmp.lt.s32.totalorder %s1454_s13, 5 }
   0xd   : > { %s1837_s17 = smov (%p35_p4, %s1835_s17), 0  ;;  %p1544_p8 = por %p91_p6, %p90_p5 }
   0xe   : > { %s67_s21 = ssub.s32 %s1450_s12, %s1837_s17  ;;  %s74_s22 = sadd.s32 1, %s1434_s8 }
   0xf   : > { %s69_s23 = sor.u32 %s68_s18, %s67_s21  ;;  %p127_p10 = pnand %p1230_p7, %p126_p9 }
  0x10   : > { %p72_p11 = scmp.eq.s32.totalorder %s69_s23, 0  ;;  %p155_p12 = scmp.lt.s32.totalorder (!%p127_p10), %s1442_s10, 1  ;;  %v1463_v2 = vmov (!%p127_p10), 1983009808   ;;  %v219_v4 = vlaneseq (!%p127_p10)  ;;  %v1464_v5 = vmov (!%p127_p10), 1934713408  }
  0x11   : > { %130 = sbr.rel (%p127_p10) target bundleno = 351 (0x15f), region = 24  ;;  %p157_p13 = scmp.lt.s32.totalorder (!%p127_p10), %s1438_s9, 1  ;;  %v217_v3 = vunpack.c.l.s4 (!%p127_p10), %v1463_v2  ;;  %v281_v6 = vunpack.c.l.s4 (!%p127_p10), %v1464_v5  ;;  %vm1090_vm0 = vcmask (!%p127_p10), 64512   ;;  %vm1092_vm1 = vcmask (!%p127_p10), 130048  }
  0x12   : > { %s1553_s24 = scalar_select %p72_p11, %s1434_s8, %s74_s22  }
  0x13   : > { %s1456_s5 = smov (!%p127_p10), 104   ;;  %s1457_s14 = smov (!%p127_p10), 120   ;;  %v218_v7 = vunpack.c.0.s8 (!%p127_p10), %v217_v3  ;;  %v220_v8 = vshrl.u32 (!%p127_p10), %v219_v4, 7  ;;  %v282_v11 = vunpack.c.0.s8 (!%p127_p10), %v281_v6  ;;  %vm1094_vm2 = vcmask (!%p127_p10), 195584  }
  0x14   : > { %s1458_s15 = smov (!%p127_p10), 96   ;;  %s1459_s18 = smov (!%p127_p10), 112   ;;  %vm1096_vm3 = vcmask (!%p127_p10), 261120   ;;  %vm1098_vm4 = vcmask (!%p127_p10), 326656   ;;  %vm1100_vm5 = vcmask (!%p127_p10), 392192   ;;  %vm1102_vm6 = vcmask (!%p127_p10), 457728  }
  0x15   : > { %s1460_s21 = smov (!%p127_p10), 80   ;;  %s1461_s22 = smov (!%p127_p10), 88   ;;  %v1585_v12 = vsub.s32 (!%p127_p10), %v218_v7, %v220_v8  ;;  %v1587_v19 = vsub.s32 (!%p127_p10), %v282_v11, %v220_v8  ;;  %vm1104_vm7 = vcmask (!%p127_p10), 523264   ;;  %vm1106_vm8 = vcmask (!%p127_p10), 588800  }
  0x16   : > { %s1462_s23 = smov (!%p127_p10), 72   ;;  %s1471_s2 = smov (!%p127_p10), 56   ;;  %vm1108_vm9 = vcmask (!%p127_p10), 654336   ;;  %vm1110_vm10 = vcmask (!%p127_p10), 719872   ;;  %vm1112_vm11 = vcmask (!%p127_p10), 785408   ;;  %vm1114_vm12 = vcmask (!%p127_p10), 850944  }
  0x17   : > { %s1472_s3 = smov (!%p127_p10), 64   ;;  %vm1116_vm13 = vcmask (!%p127_p10), 916480   ;;  %vm1118_vm14 = vcmask (!%p127_p10), 982016  }
  0x18   : > { %s156_s25 = scalar_select %p155_p12, %s1442_s10, 1 }
  0x19   : > { %s158_s26 = scalar_select %p157_p13, %s1438_s9, 1 }
  0x1a   : > { %s1233_s27 = sshll.u32 %s156_s25, 2  ;;  %s1465_s25 = smov 16  }
  0x1b   : > { %s1232_s28 = sshll.u32 %s158_s26, 1  ;;  %s1466_s26 = smov 8  }
  0x1c   : > { %s164_s29 = sadd.s32 %s1233_s27, %s1232_s28  ;;  %s1467_s27 = smov 24  }
  0x1d   : > { %s1234_s30 = sshll.u32 %s164_s29, 3  ;;  %s1468_s28 = smov 32  }
  0x1e   : > { %s166_s4 = scalar_lea.vmem %s1821_s0, %s1234_s30  ;;  %s1469_s29 = smov 40  }
  0x1f   : > { %v168_v0 = vld [vmem:[%s166_s4] sm:$0xff]  ;;  %v1568_v1 = vld [vmem:[%s166_s4 + $0x8] sm:$0xff]  ;;  %s1470_s30 = smov 48   ;;  %s151_s4 = sand.u32 1, %s1430_s7  }
  0x20   : > { %184 = vrot.lane.b32.xlu1 %v168_v0, %s1456_s5  ;;  %172 = vrot.lane.b32.xlu0 %v168_v0, %s1457_s14 }
  0x24   : > { %190 = vrot.lane.b32.xlu1 %v168_v0, %s1458_s15  ;;  %178 = vrot.lane.b32.xlu0 %v168_v0, %s1459_s18 }
  0x28   : > { %202 = vrot.lane.b32.xlu1 %v168_v0, %s1460_s21  ;;  %196 = vrot.lane.b32.xlu0 %v168_v0, %s1461_s22 }
  0x2c   : > { %174 = vrot.lane.b32.xlu1 %v1568_v1, %s1457_s14  ;;  %208 = vrot.lane.b32.xlu0 %v168_v0, %s1462_s23 }
  0x30   : > { %186 = vrot.lane.b32.xlu1 %v1568_v1, %s1456_s5  ;;  %180 = vrot.lane.b32.xlu0 %v1568_v1, %s1459_s18 }
  0x34   : > { %198 = vrot.lane.b32.xlu1 %v1568_v1, %s1461_s22  ;;  %192 = vrot.lane.b32.xlu0 %v1568_v1, %s1458_s15 }
  0x38   : > { %210 = vrot.lane.b32.xlu1 %v1568_v1, %s1462_s23  ;;  %204 = vrot.lane.b32.xlu0 %v1568_v1, %s1460_s21 }
  0x92   : > { %v185_v9 = vpop.permute.xlu1 %184  ;;  %v173_v10 = vpop.permute.xlu0 %172 }
  0x93   : > { %v230_v13 = vcombine.low %v173_v10, %v185_v9  ;;  %v231_v14 = vcombine.high %v173_v10, %v185_v9 }
  0x95   : > { %v238_v20 = vrot.slane %v230_v13, %v1585_v12  ;;  %v245_v21 = vrot.slane %v231_v14, %v1585_v12 }
  0x96   : > { %v191_v15 = vpop.permute.xlu1 %190  ;;  %v179_v16 = vpop.permute.xlu0 %178 }
  0x97   : > { %v214_v17 = vcombine.low %v168_v0, %v179_v16  ;;  %v215_v18 = vcombine.high %v168_v0, %v179_v16 }
  0x99   : > { %v222_v22 = vrot.slane %v214_v17, %v1585_v12  ;;  %v229_v23 = vrot.slane %v215_v18, %v1585_v12 }
  0x9a   : > { %v203_v24 = vpop.permute.xlu1 %202  ;;  %v197_v25 = vpop.permute.xlu0 %196 }
  0x9b   : > { %v278_v26 = vcombine.low %v222_v22, %v238_v20  ;;  %v279_v27 = vcombine.high %v222_v22, %v238_v20  ;;  %v294_v28 = vcombine.low %v229_v23, %v245_v21  ;;  %v295_v29 = vcombine.high %v229_v23, %v245_v21 }
  0x9c   : > { %v246_v34 = vcombine.low %v191_v15, %v203_v24  ;;  %v247_v35 = vcombine.high %v191_v15, %v203_v24 }
  0x9d   : > { %v286_v30 = vrot.slane %v278_v26, %v1587_v19  ;;  %v293_v31 = vrot.slane %v279_v27, %v1587_v19  ;;  %v302_v32 = vrot.slane %v294_v28, %v1587_v19  ;;  %v309_v33 = vrot.slane %v295_v29, %v1587_v19 }
  0x9e   : > { %v175_v36 = vpop.permute.xlu1 %174  ;;  %v209_v37 = vpop.permute.xlu0 %208  ;;  %v254_v46 = vrot.slane %v246_v34, %v1585_v12  ;;  %v261_v47 = vrot.slane %v247_v35, %v1585_v12 }
  0x9f   : > { %v1235_v38 = vcombine.low %v286_v30, %v293_v31  ;;  %v1237_v39 = vcombine.high %v286_v30, %v293_v31  ;;  %v1239_v40 = vcombine.low %v302_v32, %v309_v33  ;;  %v1241_v41 = vcombine.high %v302_v32, %v309_v33 }
  0xa0   : > { %v262_v42 = vcombine.low %v197_v25, %v209_v37  ;;  %v263_v43 = vcombine.high %v197_v25, %v209_v37 }
  0xa1   : > { %v1598_v44 = vrot.slane %v1235_v38, %v1585_v12  ;;  %v1601_v45 = vrot.slane %v1237_v39, %v1585_v12  ;;  %v1608_v52 = vrot.slane %v1239_v40, %v1585_v12  ;;  %v1611_v53 = vrot.slane %v1241_v41, %v1585_v12 }
  0xa2   : > { %v270_v48 = vrot.slane %v262_v42, %v1585_v12  ;;  %v277_v49 = vrot.slane %v263_v43, %v1585_v12  ;;  %v187_v50 = vpop.permute.xlu1 %186  ;;  %v181_v51 = vpop.permute.xlu0 %180 }
  0xa3   : > { %v550_v54 = vcombine.low %v1598_v44, %v1601_v45  ;;  %v366_v59 = vcombine.low %v175_v36, %v187_v50  ;;  %v367_v60 = vcombine.high %v175_v36, %v187_v50  ;;  %v350_v61 = vcombine.low %v1568_v1, %v181_v51 }
  0xa4   : > { %v310_v55 = vcombine.low %v254_v46, %v270_v48  ;;  %v311_v56 = vcombine.high %v254_v46, %v270_v48  ;;  %v326_v57 = vcombine.low %v261_v47, %v277_v49  ;;  %v327_v58 = vcombine.high %v261_v47, %v277_v49 }
  0xa5   : > { %v351_v62 = vcombine.high %v1568_v1, %v181_v51  ;;  %v374_v6 = vrot.slane %v366_v59, %v1585_v12  ;;  %v381_v7 = vrot.slane %v367_v60, %v1585_v12  ;;  %v358_v8 = vrot.slane %v350_v61, %v1585_v12 }
  0xa6   : > { %v318_v63 = vrot.slane %v310_v55, %v1587_v19  ;;  %v325_v0 = vrot.slane %v311_v56, %v1587_v19  ;;  %v334_v2 = vrot.slane %v326_v57, %v1587_v19  ;;  %v341_v3 = vrot.slane %v327_v58, %v1587_v19  ;;  %v199_v4 = vpop.permute.xlu1 %198  ;;  %v193_v5 = vpop.permute.xlu0 %192 }
  0xa7   : > { %v365_v9 = vrot.slane %v351_v62, %v1585_v12  ;;  %v414_v14 = vcombine.low %v358_v8, %v374_v6  ;;  %v415_v15 = vcombine.high %v358_v8, %v374_v6  ;;  %v551_v29 = vcombine.high %v1598_v44, %v1601_v45 }
  0xa8   : > { %v1236_v10 = vcombine.low %v318_v63, %v325_v0  ;;  %v1238_v1 = vcombine.high %v318_v63, %v325_v0  ;;  %v1240_v11 = vcombine.low %v334_v2, %v341_v3  ;;  %v1242_v13 = vcombine.high %v334_v2, %v341_v3 }
  0xa9   : > { %v430_v16 = vcombine.low %v365_v9, %v381_v7  ;;  %v431_v17 = vcombine.high %v365_v9, %v381_v7  ;;  %v422_v23 = vrot.slane %v414_v14, %v1587_v19  ;;  %v429_v24 = vrot.slane %v415_v15, %v1587_v19 }
  0xaa   : > { %v501_v18 = vrot.slane %v1236_v10, %v1585_v12  ;;  %v517_v20 = vrot.slane %v1238_v1, %v1585_v12  ;;  %v1628_v21 = vrot.slane %v1240_v11, %v1585_v12  ;;  %v1631_v22 = vrot.slane %v1242_v13, %v1585_v12  ;;  %v211_v27 = vpop.permute.xlu1 %210  ;;  %v205_v28 = vpop.permute.xlu0 %204 }
  0xab   : > { %v438_v25 = vrot.slane %v430_v16, %v1587_v19  ;;  %v445_v26 = vrot.slane %v431_v17, %v1587_v19  ;;  %v582_v30 = vcombine.low %v1608_v52, %v1611_v53  ;;  %v583_v31 = vcombine.high %v1608_v52, %v1611_v53 }
  0xac   : > { %v566_v32 = vcombine.low %v501_v18, %v517_v20  ;;  %v1243_v33 = vcombine.low %v422_v23, %v429_v24  ;;  %v1245_v34 = vcombine.high %v422_v23, %v429_v24  ;;  %v398_v37 = vcombine.low %v199_v4, %v211_v27 }
  0xad   : > { %v1247_v35 = vcombine.low %v438_v25, %v445_v26  ;;  %v1249_v36 = vcombine.high %v438_v25, %v445_v26  ;;  %v399_v38 = vcombine.high %v199_v4, %v211_v27  ;;  %v382_v39 = vcombine.low %v193_v5, %v205_v28 }
  0xae   : > { %v383_v40 = vcombine.high %v193_v5, %v205_v28  ;;  %v567_v41 = vcombine.high %v501_v18, %v517_v20  ;;  %v598_v42 = vcombine.low %v1628_v21, %v1631_v22  ;;  %v1646_v43 = vrot.slane %v1243_v33, %v1585_v12 }
  0xaf   : > { %v1649_v46 = vrot.slane %v1245_v34, %v1585_v12  ;;  %v406_v47 = vrot.slane %v398_v37, %v1585_v12  ;;  %v413_v48 = vrot.slane %v399_v38, %v1585_v12  ;;  %v390_v49 = vrot.slane %v382_v39, %v1585_v12 }
  0xb0   : > { %v397_v50 = vrot.slane %v383_v40, %v1585_v12  ;;  %v599_v51 = vcombine.high %v1628_v21, %v1631_v22  ;;  %v1658_v55 = vrot.slane %v1247_v35, %v1585_v12  ;;  %v1661_v56 = vrot.slane %v1249_v36, %v1585_v12 }
  0xb1   : > { %v686_v57 = vcombine.low %v1646_v43, %v1649_v46  ;;  %v446_v58 = vcombine.low %v390_v49, %v406_v47  ;;  %v447_v59 = vcombine.high %v390_v49, %v406_v47  ;;  %v558_v62 = vrot.slane %v550_v54, %v1587_v19 }
  0xb2   : > { %v462_v60 = vcombine.low %v397_v50, %v413_v48  ;;  %v463_v61 = vcombine.high %v397_v50, %v413_v48  ;;  %v565_v63 = vrot.slane %v551_v29, %v1587_v19  ;;  %v574_v0 = vrot.slane %v566_v32, %v1587_v19 }
  0xb3   : > { %v581_v2 = vrot.slane %v567_v41, %v1587_v19  ;;  %v454_v3 = vrot.slane %v446_v58, %v1587_v19  ;;  %v461_v4 = vrot.slane %v447_v59, %v1587_v19  ;;  %v687_v16 = vcombine.high %v1646_v43, %v1649_v46 }
  0xb4   : > { %v470_v5 = vrot.slane %v462_v60, %v1587_v19  ;;  %v477_v6 = vrot.slane %v463_v61, %v1587_v19  ;;  %v1251_v7 = vcombine.low %v558_v62, %v565_v63  ;;  %v1253_v8 = vcombine.high %v558_v62, %v565_v63 }
  0xb5   : > { %v1255_v9 = vcombine.low %v574_v0, %v581_v2  ;;  %v1257_v10 = vcombine.high %v574_v0, %v581_v2  ;;  %v1244_v44 = vcombine.low %v454_v3, %v461_v4  ;;  %v1246_v45 = vcombine.high %v454_v3, %v461_v4 }
  0xb6   : > { %v1248_v54 = vcombine.low %v470_v5, %v477_v6  ;;  %v1250_v1 = vcombine.high %v470_v5, %v477_v6  ;;  %v766_v11 = vrot.slane %v1251_v7, %v1585_v12  ;;  %v782_v13 = vrot.slane %v1253_v8, %v1585_v12 }
  0xb7   : > { %v798_v14 = vrot.slane %v1255_v9, %v1585_v12  ;;  %v814_v15 = vrot.slane %v1257_v10, %v1585_v12  ;;  %v718_v17 = vcombine.low %v1658_v55, %v1661_v56  ;;  %v637_v18 = vrot.slane %v1244_v44, %v1585_v12 }
  0xb8   : > { %v653_v20 = vrot.slane %v1246_v45, %v1585_v12  ;;  %v823_v21 = vcombine.high %v766_v11, %v782_v13  ;;  %v822_v23 = vcombine.low %v766_v11, %v782_v13  ;;  %v1687_v25 = vrot.slane %v1248_v54, %v1585_v12 }
  0xb9   : > { %v855_v22 = vcombine.high %v798_v14, %v814_v15  ;;  %v854_v24 = vcombine.low %v798_v14, %v814_v15  ;;  %v1690_v26 = vrot.slane %v1250_v1, %v1585_v12  ;;  %v590_v35 = vrot.slane %v582_v30, %v1587_v19 }
  0xba   : > { %v702_v27 = vcombine.low %v637_v18, %v653_v20  ;;  %v703_v28 = vcombine.high %v637_v18, %v653_v20  ;;  %v837_v29 = vrot.slane %v823_v21, %v1587_v19  ;;  %v1695_v33 = vrot.slane %v822_v23, %v1587_v19 }
  0xbb   : > { %v869_v32 = vrot.slane %v855_v22, %v1587_v19  ;;  %v1698_v34 = vrot.slane %v854_v24, %v1587_v19  ;;  %v597_v36 = vrot.slane %v583_v31, %v1587_v19  ;;  %v606_v37 = vrot.slane %v598_v42, %v1587_v19 }
  0xbc   : > { %v613_v38 = vrot.slane %v599_v51, %v1587_v19  ;;  %v694_v43 = vrot.slane %v686_v57, %v1587_v19  ;;  %v701_v52 = vrot.slane %v687_v16, %v1587_v19  ;;  %v710_v53 = vrot.slane %v702_v27, %v1587_v19 }
  0xbd   : > { %v888_v39 = vcombine.low %v837_v29, %v869_v32  ;;  %v887_v40 = vcombine.high %v1695_v33, %v1698_v34  ;;  %v889_v41 = vcombine.high %v837_v29, %v869_v32  ;;  %v1252_v46 = vcombine.low %v590_v35, %v597_v36 }
  0xbe   : > { %v1254_v47 = vcombine.high %v590_v35, %v597_v36  ;;  %v1256_v48 = vcombine.low %v606_v37, %v613_v38  ;;  %v1258_v30 = vcombine.high %v606_v37, %v613_v38  ;;  %v717_v31 = vrot.slane %v703_v28, %v1587_v19 }
  0xbf   : > { %1035 = vrot.lane.b32.xlu1 %v888_v39, %s1465_s25  ;;  %1031 = vrot.lane.b32.xlu0 %v887_v40, %s1466_s26  ;;  %v773_v42 = vrot.slane %v1252_v46, %v1585_v12  ;;  %v1259_v57 = vcombine.low %v694_v43, %v701_v52  ;;  %v1261_v58 = vcombine.high %v694_v43, %v701_v52 }
  0xc0   : > { %v789_v49 = vrot.slane %v1254_v47, %v1585_v12  ;;  %v805_v50 = vrot.slane %v1256_v48, %v1585_v12  ;;  %v821_v51 = vrot.slane %v1258_v30, %v1585_v12  ;;  %v1263_v59 = vcombine.low %v710_v53, %v717_v31 }
  0xc1   : > { %v1265_v60 = vcombine.high %v710_v53, %v717_v31  ;;  %v902_v2 = vrot.slane %v1259_v57, %v1585_v12  ;;  %v918_v3 = vrot.slane %v1261_v58, %v1585_v12  ;;  %v719_v6 = vcombine.high %v1658_v55, %v1661_v56 }
  0xc2   : > { %v838_v61 = vcombine.low %v773_v42, %v789_v49  ;;  %v870_v62 = vcombine.low %v805_v50, %v821_v51  ;;  %v839_v63 = vcombine.high %v773_v42, %v789_v49  ;;  %v871_v0 = vcombine.high %v805_v50, %v821_v51 }
  0xc3   : > { %1039 = vrot.lane.b32.xlu0 %v889_v41, %s1467_s27  ;;  %v934_v4 = vrot.slane %v1263_v59, %v1585_v12  ;;  %v950_v5 = vrot.slane %v1265_v60, %v1585_v12  ;;  %v734_v7 = vcombine.low %v1687_v25, %v1690_v26  ;;  %v958_v44 = vcombine.low %v902_v2, %v918_v3  ;;  %s1473_s27 = smov [#allocation2]  }
  0xc4   : > { %v846_v8 = vrot.slane %v838_v61, %v1587_v19  ;;  %v878_v9 = vrot.slane %v870_v62, %v1587_v19  ;;  %v885_v10 = vrot.slane %v871_v0, %v1587_v19  ;;  %v735_v54 = vcombine.high %v1687_v25, %v1690_v26 }
  0xc5   : > { %v990_v45 = vcombine.low %v934_v4, %v950_v5  ;;  %v853_v13 = vrot.slane %v839_v63, %v1587_v19  ;;  %v726_v15 = vrot.slane %v718_v17, %v1587_v19  ;;  %v733_v16 = vrot.slane %v719_v6, %v1587_v19 }
  0xc6   : > { %v890_v1 = vcombine.low %v846_v8, %v878_v9  ;;  %v891_v11 = vcombine.high %v846_v8, %v878_v9  ;;  %v742_v18 = vrot.slane %v734_v7, %v1587_v19  ;;  %v966_v22 = vrot.slane %v958_v44, %v1587_v19 }
  0xc7   : > { %v998_v14 = vrot.slane %v990_v45, %v1587_v19  ;;  %v892_v20 = vcombine.low %v853_v13, %v885_v10  ;;  %v893_v21 = vcombine.high %v853_v13, %v885_v10  ;;  %v991_v23 = vcombine.high %v934_v4, %v950_v5 }
  0xc8   : > { %1043 = vrot.lane.b32.xlu1 %v890_v1, %s1468_s28  ;;  %1047 = vrot.lane.b32.xlu0 %v891_v11, %s1469_s29  ;;  %v749_v24 = vrot.slane %v735_v54, %v1587_v19  ;;  %v1260_v25 = vcombine.low %v726_v15, %v733_v16  ;;  %v1262_v26 = vcombine.high %v726_v15, %v733_v16  ;;  %s1364_s28 = sshll.u32 %s1473_s27, 4  ;;  %s1365_s28 = int_to_ptr.vmem [resolvable:$false] %s1364_s28 }
  0xc9   : > { %v886_v27 = vcombine.low %v1695_v33, %v1698_v34  ;;  %v1022_v28 = vcombine.low %v966_v22, %v998_v14  ;;  %v959_v29 = vcombine.high %v902_v2, %v918_v3  ;;  %v1023_v35 = vcombine.high %v966_v22, %v998_v14  ;;  %s1366_s29 = scalar_lea.vmem %s1365_s28, 256 }
  0xca   : > { %v909_v55 = vrot.slane %v1260_v25, %v1585_v12  ;;  %v925_v56 = vrot.slane %v1262_v26, %v1585_v12  ;;  %v1264_v17 = vcombine.low %v742_v18, %v749_v24  ;;  %v1266_v32 = vcombine.high %v742_v18, %v749_v24 }
  0xcb   : > { %v1005_v36 = vrot.slane %v991_v23, %v1587_v19  ;;  %v973_v33 = vrot.slane %v959_v29, %v1587_v19 }
  0xcc   : > { %1051 = vrot.lane.b32.xlu1 %v892_v20, %s1470_s30  ;;  %1055 = vrot.lane.b32.xlu0 %v893_v21, %s1471_s2  ;;  %v941_v37 = vrot.slane %v1264_v17, %v1585_v12  ;;  %v957_v38 = vrot.slane %v1266_v32, %v1585_v12  ;;  %v974_v34 = vcombine.low %v909_v55, %v925_v56 }
  0xcd   : > { %v1024_v40 = vcombine.low %v973_v33, %v1005_v36  ;;  %v1025_v41 = vcombine.high %v973_v33, %v1005_v36  ;;  %v975_v12 = vcombine.high %v909_v55, %v925_v56 }
  0xce   : > { %v1006_v39 = vcombine.low %v941_v37, %v957_v38  ;;  %v1007_v43 = vcombine.high %v941_v37, %v957_v38  ;;  %v982_v47 = vrot.slane %v974_v34, %v1587_v19 }
  0xcf   : > { %v989_v53 = vrot.slane %v975_v12, %v1587_v19 }
  0xd0   : > { %1059 = vrot.lane.b32.xlu1 %v1022_v28, %s1472_s3  ;;  %1063 = vrot.lane.b32.xlu0 %v1023_v35, %s1462_s23  ;;  %v1014_v46 = vrot.slane %v1006_v39, %v1587_v19  ;;  %v1021_v52 = vrot.slane %v1007_v43, %v1587_v19 }
  0xd2   : > { %v1026_v48 = vcombine.low %v982_v47, %v1014_v46  ;;  %v1027_v30 = vcombine.high %v982_v47, %v1014_v46  ;;  %v1028_v31 = vcombine.low %v989_v53, %v1021_v52  ;;  %v1029_v42 = vcombine.high %v989_v53, %v1021_v52 }
  0xd4   : > { %1067 = vrot.lane.b32.xlu1 %v1024_v40, %s1460_s21  ;;  %1071 = vrot.lane.b32.xlu0 %v1025_v41, %s1461_s22 }
  0xd8   : > { %1075 = vrot.lane.b32.xlu1 %v1026_v48, %s1458_s15  ;;  %1079 = vrot.lane.b32.xlu0 %v1027_v30, %s1456_s5  ;;  %s1231_s5 = sshll.u32 %s151_s4, 3 }
  0xd9   : > { %s153_s21 = scalar_lea.vmem [#allocation2], %s1231_s5 }
  0xda   : > { %s1138_s22 = sshll.u32 %s153_s21, 4  ;;  %s1770_s22 = int_to_ptr.vmem [resolvable:$true] %s1138_s22 }
  0xdb   : > { %s1360_s26 = scalar_lea.vmem %s1770_s22, 128  ;;  %p1367_p4 = scmp.lt.s32.totalorder %s1770_s22, %s1365_s28 }
  0xdc   : > { %1083 = vrot.lane.b32.xlu1 %v1028_v31, %s1459_s18  ;;  %1087 = vrot.lane.b32.xlu0 %v1029_v42, %s1457_s14  ;;  %s1268_s14 = sshll.u32 %s1442_s10, 1  ;;  %p1361_p0 = scmp.ne.s32.totalorder %s1770_s22, %s1360_s26 }
  0xdd   : > { %s1134_s15 = sadd.s32 %s1438_s9, %s1268_s14  ;;  %s1122_s9 = scalar_lea.sflag [#allocation3], %s151_s4 }
  0xde   : > { %s1269_s18 = sshll.u32 %s1134_s15, 7  ;;  %p1362_p1 = pnand %p1361_p0, %p1535_p3 }
  0xdf   : > { %s1768_s25 = scalar_lea.hbm %s1822_s1, %s1269_s18  ;;  %p1368_p5 = scmp.lt.s32.totalorder %s1366_s29, %s1360_s26 }
  0xe0   : > { %p1363_p2 = pneg %p1362_p1 }
  0xe1   : > { %p1369_p6 = por %p1368_p5, %p1367_p4 }
  0xe3   : > { %p1370_p7 = pnand %p1369_p6, %p1363_p2 }
 0x131   : > { %v1032_v49 = vpop.permute.xlu0 %1031  ;;  %v1036_v50 = vpop.permute.xlu1 %1035 }
 0x132   : > { %v1091_v51 = vsel %vm1090_vm0, %v886_v27, %v1032_v49 }
 0x133   : > { %v1093_v58 = vsel %vm1092_vm1, %v1091_v51, %v1036_v50 }
 0x135   : > { %v1040_v57 = vpop.permute.xlu0 %1039 }
 0x136   : > { %v1095_v59 = vsel %vm1094_vm2, %v1093_v58, %v1040_v57 }
 0x13a   : > { %v1044_v60 = vpop.permute.xlu1 %1043  ;;  %v1048_v19 = vpop.permute.xlu0 %1047 }
 0x13b   : > { %v1097_v61 = vsel %vm1096_vm3, %v1095_v59, %v1044_v60 }
 0x13c   : > { %v1099_v62 = vsel %vm1098_vm4, %v1097_v61, %v1048_v19 }
 0x13e   : > { %v1052_v63 = vpop.permute.xlu1 %1051  ;;  %v1056_v0 = vpop.permute.xlu0 %1055 }
 0x13f   : > { %v1101_v2 = vsel %vm1100_vm5, %v1099_v62, %v1052_v63 }
 0x140   : > { %v1103_v3 = vsel %vm1102_vm6, %v1101_v2, %v1056_v0 }
 0x142   : > { %v1060_v4 = vpop.permute.xlu1 %1059  ;;  %v1064_v5 = vpop.permute.xlu0 %1063 }
 0x143   : > { %v1105_v6 = vsel %vm1104_vm7, %v1103_v3, %v1060_v4 }
 0x144   : > { %v1107_v7 = vsel %vm1106_vm8, %v1105_v6, %v1064_v5 }
 0x146   : > { %v1068_v8 = vpop.permute.xlu1 %1067  ;;  %v1072_v9 = vpop.permute.xlu0 %1071 }
 0x147   : > { %v1109_v10 = vsel %vm1108_vm9, %v1107_v7, %v1068_v8 }
 0x148   : > { %v1111_v44 = vsel %vm1110_vm10, %v1109_v10, %v1072_v9 }
 0x14a   : > { %v1076_v45 = vpop.permute.xlu1 %1075  ;;  %v1080_v54 = vpop.permute.xlu0 %1079 }
 0x14b   : > { %v1113_v1 = vsel %vm1112_vm11, %v1111_v44, %v1076_v45 }
 0x14c   : > { %v1115_v11 = vsel %vm1114_vm12, %v1113_v1, %v1080_v54 }
 0x14e   : > { %v1084_v13 = vpop.permute.xlu1 %1083  ;;  %v1088_v14 = vpop.permute.xlu0 %1087 }
 0x14f   : > { %v1117_v15 = vsel %vm1116_vm13, %v1115_v11, %v1084_v13 }
 0x150   : > { %v1119_v16 = vsel %vm1118_vm14, %v1117_v15, %v1088_v14 }
 0x151   : > { %1120 = vst [vmem:[%s153_s21] sm:$0xff] %v1119_v16 }
 0x152   : > { %1373 = shalt.err (!%p1370_p7)
}
 0x153   : > { %s1374_s30 = scalar_lea.hbm %s1768_s25, 128  ;;  %s1378_s4 = scalar_lea.hbm %s1822_s1, 512 }
 0x154   : > { %p1375_p9 = scmp.ne.s32.totalorder %s1768_s25, %s1374_s30  ;;  %p1379_p12 = scmp.lt.u32.totalorder %s1768_s25, %s1822_s1 }
 0x155   : > { %p1380_p13 = scmp.lt.u32.totalorder %s1378_s4, %s1374_s30  ;;  %p1382_p1 = scmp.lt.u32.totalorder %s1374_s30, %s1768_s25 }
 0x156   : > { %p1376_p10 = pnand %p1375_p9, %p1535_p3 }
 0x157   : > { %p1381_p0 = por %p1380_p13, %p1379_p12 }
 0x158   : > { %p1377_p11 = pneg %p1376_p10 }
 0x159   : > { %p1383_p2 = por %p1382_p1, %p1381_p0 }
 0x15b   : > { %p1384_p4 = pnand %p1383_p2, %p1377_p11 }
 0x15d   : > { %1387 = shalt.err (!%p1384_p4)
}
 0x15e   : > { %1272 = dma.vmem_to_hbm [thread:$0]  (%p1535_p3), %s1770_s22, 128, %s1768_s25, %s1122_s9  }
 0x15f PF: > { %p1278_p5 = scmp.ge.s32.totalorder %s1454_s13, 2  ;;  %s1150_s15 = sand.u32 1, %s1426_s6  }
 0x160   : > { %s1151_s18 = scalar_lea.sflag [#allocation3], %s1150_s15 }
 0x161   : > { %p1275_p6 = pnand %p1278_p5, %p1544_p8 }
 0x163   : > { %1421 = dma.done.wait (!%p1275_p6), %s1151_s18, 128  }
 0x164   : > { %1423 = vsyncadd (!%p1275_p6), %s1151_s18, 4294967168  ;;  %s14_s13 = sadd.s32 1, %s1454_s13   ;;  %s1825_s6 = smov %s1430_s7 }
 0x165   : > { %p11_p7 = scmp.ge.s32.totalorder %s14_s13, 6   ;;  %s1826_s7 = smov %s1434_s8 }
 0x166   : > { %s1827_s8 = smov %s1553_s24  ;;  %s1828_s9 = smov %s1446_s11 }
 0x167   : > { %s1829_s10 = smov %s1450_s12  ;;  %s1830_s11 = smov %s1833_s16 }
 0x168   : > { %s1831_s12 = smov %s1837_s17  ;;  %13 = sbr.rel (!%p11_p7) target bundleno = 5 (0x5), region = 59 }
 0x16f   :  { %1156 = vsyncpa [#allocation3], 1 }
 0x170   :  { %1158 = vsyncpa [#allocation3 + $0x1], 1 }

</bundles_post_ra>
